<compile_context>
chip_gen: v7x
topology: tpu7x:2x2x1
jax: 0.10.0
libtpu: 0.0.40
codegen_flags: <defaults>
</compile_context>

<pallas_src>
import jax
import jax.numpy as jnp
from jax.experimental import pallas as pl
from jax.experimental.pallas import tpu as pltpu


def _scr4_kernel(x_ref, w1_ref, b1_ref, wfc1_ref, wfc2_ref, w2_ref, b2_ref, o_ref):
    # x_ref: (1, N, C) block for one batch element. Weights are resident full blocks.
    x = x_ref[0].astype(jnp.float32)                                # (N, C)

    # conv1x1_in (+ folded BN) + ReLU  -> (N, hdim)
    t = jnp.dot(x, w1_ref[...].astype(jnp.float32),
                preferred_element_type=jnp.float32)
    t = jnp.maximum(t + b1_ref[...].astype(jnp.float32), 0.0)

    # Squeeze: adaptive average pool over spatial positions -> (1, hdim)
    m = jnp.mean(t, axis=0, keepdims=True)

    # Excitation: Linear -> ReLU -> Linear -> Sigmoid -> (1, hdim)
    g = jnp.dot(m, wfc1_ref[...].astype(jnp.float32),
                preferred_element_type=jnp.float32)                 # (1, red)
    g = jnp.maximum(g, 0.0)
    z = jnp.dot(g, wfc2_ref[...].astype(jnp.float32),
                preferred_element_type=jnp.float32)                 # (1, hdim)
    gate = 1.0 / (1.0 + jnp.exp(-z))                                # sigmoid

    # Channel re-scale, then conv1x1_out (+ folded BN) + ReLU -> (N, C)
    ts = t * gate                                                   # broadcast over N
    out = jnp.dot(ts, w2_ref[...].astype(jnp.float32),
                  preferred_element_type=jnp.float32)
    out = jnp.maximum(out + b2_ref[...].astype(jnp.float32), 0.0)
    o_ref[0] = out.astype(o_ref.dtype)


def _fold_bn(conv_w_2d, gamma, beta, mean, var, eps=1e-5):
    """Fold eval-mode BatchNorm into a bias-free 1x1 conv.

    conv_w_2d: (out, in). Returns ((in, out) weight, (1, out) bias) such that
    relu-less  y = x @ W + b  ==  BN(conv(x)).
    """
    scale = gamma / jnp.sqrt(var + eps)
    w = conv_w_2d * scale[:, None]                # (out, in)
    b = beta - mean * scale                       # (out,)
    return jnp.transpose(w), b.reshape(1, -1)


def self_correlation_computation4(x, conv1_w, bn1, fc1_w, fc2_w, conv2_w, bn2):
    """x: (B, C, H, W) NCHW.
    conv1_w: (hdim, C, 1, 1), conv2_w: (C, hdim, 1, 1)  (torch Conv2d layout, no bias)
    fc1_w: (hdim//reduction, hdim), fc2_w: (hdim, hdim//reduction)  (torch Linear, no bias)
    bn1/bn2: (gamma, beta, running_mean, running_var) for hdim / C channels.
    """
    B, C, H, W = x.shape
    hdim = conv1_w.shape[0]
    red = fc1_w.shape[0]
    N = H * W

    # Fold BN into the 1x1 convs; transpose everything to (in, out) for row-major matmul.
    w1, b1 = _fold_bn(conv1_w.reshape(hdim, C), *bn1)     # (C, hdim), (1, hdim)
    w2, b2 = _fold_bn(conv2_w.reshape(C, hdim), *bn2)     # (hdim, C), (1, C)
    wfc1 = jnp.transpose(fc1_w)                           # (hdim, red)
    wfc2 = jnp.transpose(fc2_w)                           # (red, hdim)

    # NCHW -> (B, N, C): channel on the lane axis (lane-dense loads/stores).
    x_nc = jnp.transpose(x, (0, 2, 3, 1)).reshape(B, N, C)

    flops = B * (2 * N * C * hdim          # conv1x1_in
                 + 2 * N * hdim * C        # conv1x1_out
                 + 2 * hdim * red * 2)     # the two tiny FC matmuls
    bytes_accessed = 4 * (x_nc.size + B * N * C
                          + w1.size + b1.size + wfc1.size + wfc2.size + w2.size + b2.size)

    y = pl.pallas_call(
        _scr4_kernel,
        out_shape=jax.ShapeDtypeStruct((B, N, C), x.dtype),
        grid=(B,),
        in_specs=[
            pl.BlockSpec((1, N, C), lambda b: (b, 0, 0)),
            pl.BlockSpec((C, hdim), lambda b: (0, 0)),
            pl.BlockSpec((1, hdim), lambda b: (0, 0)),
            pl.BlockSpec((hdim, red), lambda b: (0, 0)),
            pl.BlockSpec((red, hdim), lambda b: (0, 0)),
            pl.BlockSpec((hdim, C), lambda b: (0, 0)),
            pl.BlockSpec((1, C), lambda b: (0, 0)),
        ],
        out_specs=pl.BlockSpec((1, N, C), lambda b: (b, 0, 0)),
        compiler_params=pltpu.CompilerParams(
            dimension_semantics=("parallel",),
            vmem_limit_bytes=32 * 1024 * 1024,
        ),
        cost_estimate=pl.CostEstimate(
            flops=flops, transcendentals=B * hdim, bytes_accessed=bytes_accessed),
    )(x_nc, w1, b1, wfc1, wfc2, w2, b2)

    # (B, N, C) -> (B, H, W, C) -> NCHW
    return jnp.transpose(y.reshape(B, H, W, C), (0, 3, 1, 2))


def _reference(x, conv1_w, bn1, fc1_w, fc2_w, conv2_w, bn2, eps=1e-5):
    """Pure-JAX reproduction of the PyTorch forward (eval-mode BN)."""
    gamma1, beta1, mean1, var1 = bn1
    gamma2, beta2, mean2, var2 = bn2
    B, C, H, W = x.shape
    hdim = conv1_w.shape[0]

    t = jnp.einsum('bchw,oc->bohw', x, conv1_w.reshape(hdim, C))
    t = (t - mean1[None, :, None, None]) / jnp.sqrt(var1 + eps)[None, :, None, None]
    t = t * gamma1[None, :, None, None] + beta1[None, :, None, None]
    t = jnp.maximum(t, 0.0)

    y = jnp.mean(t, axis=(2, 3))                           # (B, hdim)
    y = jnp.maximum(y @ fc1_w.T, 0.0)
    y = 1.0 / (1.0 + jnp.exp(-(y @ fc2_w.T)))              # sigmoid
    t = t * y[:, :, None, None]

    out = jnp.einsum('bchw,oc->bohw', t, conv2_w.reshape(C, hdim))
    out = (out - mean2[None, :, None, None]) / jnp.sqrt(var2 + eps)[None, :, None, None]
    out = out * gamma2[None, :, None, None] + beta2[None, :, None, None]
    return jnp.maximum(out, 0.0)


if __name__ == "__main__":
    # Shapes consistent with the module: hdim=64 fixed, reduction=16, channel chosen
    # lane-dense (128) so the output store fills the 128-lane vreg width.
    B, C, H, W = 2, 128, 16, 16
    hdim, reduction = 64, 16
    red = hdim // reduction

    key = jax.random.PRNGKey(0)
    ks = jax.random.split(key, 13)

    x = jax.random.normal(ks[0], (B, C, H, W), dtype=jnp.float32)
    conv1_w = jax.random.normal(ks[1], (hdim, C, 1, 1), dtype=jnp.float32) / jnp.sqrt(C)
    conv2_w = jax.random.normal(ks[2], (C, hdim, 1, 1), dtype=jnp.float32) / jnp.sqrt(hdim)
    fc1_w = jax.random.normal(ks[3], (red, hdim), dtype=jnp.float32) / jnp.sqrt(hdim)
    fc2_w = jax.random.normal(ks[4], (hdim, red), dtype=jnp.float32) / jnp.sqrt(red)

    bn1 = (0.5 + jax.random.uniform(ks[5], (hdim,), dtype=jnp.float32),   # gamma
           0.1 * jax.random.normal(ks[6], (hdim,), dtype=jnp.float32),    # beta
           0.1 * jax.random.normal(ks[7], (hdim,), dtype=jnp.float32),    # running_mean
           0.5 + jax.random.uniform(ks[8], (hdim,), dtype=jnp.float32))   # running_var
    bn2 = (0.5 + jax.random.uniform(ks[9], (C,), dtype=jnp.float32),
           0.1 * jax.random.normal(ks[10], (C,), dtype=jnp.float32),
           0.1 * jax.random.normal(ks[11], (C,), dtype=jnp.float32),
           0.5 + jax.random.uniform(ks[12], (C,), dtype=jnp.float32))

    y = self_correlation_computation4(x, conv1_w, bn1, fc1_w, fc2_w, conv2_w, bn2)
    y = jax.block_until_ready(y)

    y_ref = _reference(x, conv1_w, bn1, fc1_w, fc2_w, conv2_w, bn2)
    assert y.shape == (B, C, H, W)
    assert jnp.allclose(y, y_ref, atol=1e-4, rtol=1e-3), "mismatch vs reference"

    print("KERNEL_OK")
</pallas_src>

<mosaic_0001>
module attributes {stable_mosaic.version = 11 : i64} {
  func.func @_scr4_kernel(%arg0: i32, %arg1: memref<1x256x128xf32, #tpu.memory_space<vmem>>, %arg2: memref<128x64xf32, #tpu.memory_space<vmem>>, %arg3: memref<1x64xf32, #tpu.memory_space<vmem>>, %arg4: memref<64x4xf32, #tpu.memory_space<vmem>>, %arg5: memref<4x64xf32, #tpu.memory_space<vmem>>, %arg6: memref<64x128xf32, #tpu.memory_space<vmem>>, %arg7: memref<1x128xf32, #tpu.memory_space<vmem>>, %arg8: memref<1x256x128xf32, #tpu.memory_space<vmem>>) attributes {dimension_semantics = [#tpu.dimension_semantics<parallel>], iteration_bounds = array<i64: 2>, scalar_prefetch = 0 : i64, scratch_operands = 0 : i64, tpu.core_type = #tpu.core_type<tc>, window_params = [{transform_indices = @transform_0, window_bounds = array<i64: 1, 256, 128>}, {pipeline_mode = #tpu.pipeline_mode<synchronous>, transform_indices = @transform_1, window_bounds = array<i64: 128, 64>}, {pipeline_mode = #tpu.pipeline_mode<synchronous>, transform_indices = @transform_2, window_bounds = array<i64: 1, 64>}, {pipeline_mode = #tpu.pipeline_mode<synchronous>, transform_indices = @transform_3, window_bounds = array<i64: 64, 4>}, {pipeline_mode = #tpu.pipeline_mode<synchronous>, transform_indices = @transform_4, window_bounds = array<i64: 4, 64>}, {pipeline_mode = #tpu.pipeline_mode<synchronous>, transform_indices = @transform_5, window_bounds = array<i64: 64, 128>}, {pipeline_mode = #tpu.pipeline_mode<synchronous>, transform_indices = @transform_6, window_bounds = array<i64: 1, 128>}, {transform_indices = @transform_7, window_bounds = array<i64: 1, 256, 128>}]} {
    %c0 = arith.constant 0 : index
    %c0_0 = arith.constant 0 : index
    %c0_1 = arith.constant 0 : index
    %0 = vector.load %arg1[%c0, %c0_0, %c0_1] : memref<1x256x128xf32, #tpu.memory_space<vmem>>, vector<1x256x128xf32>
    %1 = vector.shape_cast %0 : vector<1x256x128xf32> to vector<256x128xf32>
    %c0_2 = arith.constant 0 : index
    %c0_3 = arith.constant 0 : index
    %2 = vector.load %arg2[%c0_2, %c0_3] : memref<128x64xf32, #tpu.memory_space<vmem>>, vector<128x64xf32>
    %cst = arith.constant dense<0.000000e+00> : vector<256x64xf32>
    %3 = tpu.matmul %1, %2, %cst {dimension_numbers = #tpu.dot_dimension_numbers<[1], [0], [0], [1], [0, 0, 1, 1], [], []>} : vector<256x128xf32>, vector<128x64xf32>, vector<256x64xf32> -> vector<256x64xf32>
    %c0_4 = arith.constant 0 : index
    %c0_5 = arith.constant 0 : index
    %4 = vector.load %arg3[%c0_4, %c0_5] : memref<1x64xf32, #tpu.memory_space<vmem>>, vector<1x64xf32>
    %5 = vector.broadcast %4 : vector<1x64xf32> to vector<256x64xf32>
    %6 = arith.addf %3, %5 : vector<256x64xf32>
    %cst_6 = arith.constant 0.000000e+00 : f32
    %7 = vector.broadcast %cst_6 : f32 to vector<256x64xf32>
    %8 = arith.maximumf %6, %7 : vector<256x64xf32>
    %cst_7 = arith.constant dense<0.000000e+00> : vector<64xf32>
    %9 = vector.multi_reduction <add>, %8, %cst_7 [0] : vector<256x64xf32> to vector<64xf32>
    %10 = vector.shape_cast %9 : vector<64xf32> to vector<1x64xf32>
    %cst_8 = arith.constant 2.560000e+02 : f32
    %11 = vector.broadcast %cst_8 : f32 to vector<1x64xf32>
    %12 = arith.divf %10, %11 : vector<1x64xf32>
    %c0_9 = arith.constant 0 : index
    %c0_10 = arith.constant 0 : index
    %13 = vector.load %arg4[%c0_9, %c0_10] : memref<64x4xf32, #tpu.memory_space<vmem>>, vector<64x4xf32>
    %cst_11 = arith.constant dense<0.000000e+00> : vector<1x4xf32>
    %14 = tpu.matmul %12, %13, %cst_11 {dimension_numbers = #tpu.dot_dimension_numbers<[1], [0], [0], [1], [0, 0, 1, 1], [], []>} : vector<1x64xf32>, vector<64x4xf32>, vector<1x4xf32> -> vector<1x4xf32>
    %cst_12 = arith.constant 0.000000e+00 : f32
    %15 = vector.broadcast %cst_12 : f32 to vector<1x4xf32>
    %16 = arith.maximumf %14, %15 : vector<1x4xf32>
    %c0_13 = arith.constant 0 : index
    %c0_14 = arith.constant 0 : index
    %17 = vector.load %arg5[%c0_13, %c0_14] : memref<4x64xf32, #tpu.memory_space<vmem>>, vector<4x64xf32>
    %cst_15 = arith.constant dense<0.000000e+00> : vector<1x64xf32>
    %18 = tpu.matmul %16, %17, %cst_15 {dimension_numbers = #tpu.dot_dimension_numbers<[1], [0], [0], [1], [0, 0, 1, 1], [], []>} : vector<1x4xf32>, vector<4x64xf32>, vector<1x64xf32> -> vector<1x64xf32>
    %cst_16 = arith.constant 0.000000e+00 : f32
    %19 = vector.broadcast %cst_16 : f32 to vector<1x64xf32>
    %20 = arith.subf %19, %18 : vector<1x64xf32>
    %21 = math.exp %20 : vector<1x64xf32>
    %cst_17 = arith.constant 1.000000e+00 : f32
    %22 = vector.broadcast %cst_17 : f32 to vector<1x64xf32>
    %23 = arith.addf %22, %21 : vector<1x64xf32>
    %cst_18 = arith.constant 1.000000e+00 : f32
    %24 = vector.broadcast %cst_18 : f32 to vector<1x64xf32>
    %25 = arith.divf %24, %23 : vector<1x64xf32>
    %26 = vector.broadcast %25 : vector<1x64xf32> to vector<256x64xf32>
    %27 = arith.mulf %8, %26 : vector<256x64xf32>
    %c0_19 = arith.constant 0 : index
    %c0_20 = arith.constant 0 : index
    %28 = vector.load %arg6[%c0_19, %c0_20] : memref<64x128xf32, #tpu.memory_space<vmem>>, vector<64x128xf32>
    %cst_21 = arith.constant dense<0.000000e+00> : vector<256x128xf32>
    %29 = tpu.matmul %27, %28, %cst_21 {dimension_numbers = #tpu.dot_dimension_numbers<[1], [0], [0], [1], [0, 0, 1, 1], [], []>} : vector<256x64xf32>, vector<64x128xf32>, vector<256x128xf32> -> vector<256x128xf32>
    %c0_22 = arith.constant 0 : index
    %c0_23 = arith.constant 0 : index
    %30 = vector.load %arg7[%c0_22, %c0_23] : memref<1x128xf32, #tpu.memory_space<vmem>>, vector<1x128xf32>
    %31 = vector.broadcast %30 : vector<1x128xf32> to vector<256x128xf32>
    %32 = arith.addf %29, %31 : vector<256x128xf32>
    %cst_24 = arith.constant 0.000000e+00 : f32
    %33 = vector.broadcast %cst_24 : f32 to vector<256x128xf32>
    %34 = arith.maximumf %32, %33 : vector<256x128xf32>
    %c0_25 = arith.constant 0 : index
    %c0_26 = arith.constant 0 : index
    %c0_27 = arith.constant 0 : index
    %35 = vector.load %arg8[%c0_25, %c0_26, %c0_27] : memref<1x256x128xf32, #tpu.memory_space<vmem>>, vector<1x256x128xf32>
    %36 = vector.shape_cast %35 : vector<1x256x128xf32> to vector<256x128xf32>
    %37 = vector.shape_cast %34 : vector<256x128xf32> to vector<1x256x128xf32>
    tpu.vector_store %arg8[%c0_25, %c0_26, %c0_27], %37 {strides = array<i32>} : memref<1x256x128xf32, #tpu.memory_space<vmem>>, vector<1x256x128xf32>,
    return
  }
  func.func @transform_0(%arg0: i32) -> (i32, i32, i32) {
    %c0_i32 = arith.constant 0 : i32
    %c0_i32_0 = arith.constant 0 : i32
    %c0_i32_1 = arith.constant 0 : i32
    return %arg0, %c0_i32, %c0_i32_0 : i32, i32, i32
  }
  func.func @transform_1(%arg0: i32) -> (i32, i32) {
    %c0_i32 = arith.constant 0 : i32
    %c0_i32_0 = arith.constant 0 : i32
    %c0_i32_1 = arith.constant 0 : i32
    return %c0_i32, %c0_i32_0 : i32, i32
  }
  func.func @transform_2(%arg0: i32) -> (i32, i32) {
    %c0_i32 = arith.constant 0 : i32
    %c0_i32_0 = arith.constant 0 : i32
    %c0_i32_1 = arith.constant 0 : i32
    return %c0_i32, %c0_i32_0 : i32, i32
  }
  func.func @transform_3(%arg0: i32) -> (i32, i32) {
    %c0_i32 = arith.constant 0 : i32
    %c0_i32_0 = arith.constant 0 : i32
    %c0_i32_1 = arith.constant 0 : i32
    return %c0_i32, %c0_i32_0 : i32, i32
  }
  func.func @transform_4(%arg0: i32) -> (i32, i32) {
    %c0_i32 = arith.constant 0 : i32
    %c0_i32_0 = arith.constant 0 : i32
    %c0_i32_1 = arith.constant 0 : i32
    return %c0_i32, %c0_i32_0 : i32, i32
  }
  func.func @transform_5(%arg0: i32) -> (i32, i32) {
    %c0_i32 = arith.constant 0 : i32
    %c0_i32_0 = arith.constant 0 : i32
    %c0_i32_1 = arith.constant 0 : i32
    return %c0_i32, %c0_i32_0 : i32, i32
  }
  func.func @transform_6(%arg0: i32) -> (i32, i32) {
    %c0_i32 = arith.constant 0 : i32
    %c0_i32_0 = arith.constant 0 : i32
    %c0_i32_1 = arith.constant 0 : i32
    return %c0_i32, %c0_i32_0 : i32, i32
  }
  func.func @transform_7(%arg0: i32) -> (i32, i32, i32) {
    %c0_i32 = arith.constant 0 : i32
    %c0_i32_0 = arith.constant 0 : i32
    %c0_i32_1 = arith.constant 0 : i32
    return %arg0, %c0_i32, %c0_i32_0 : i32, i32, i32
  }
}

</mosaic_0001>

<bundles_post_ra>
// kernel: tpu_custom_call.1
= control target key start
LH: loop header
LB: loop body
LE: loop exit
PB: predicated region body
PF: predicated region fallthrough
CT: control target
= control target key end

     0   :  { %12 = vsyncpa [#allocation3], 0  ;;  %s2691_s0 = inlined_call_operand.hbm [shape: f32[2,256,128], index: 0, kind: input, shape index: {}]   ;;  %s2692_s1 = inlined_call_operand.vmem [shape: f32[128,64], index: 1, kind: input, shape index: {}]   ;;  %s2693_s2 = inlined_call_operand.vmem [shape: f32[1,64], index: 2, kind: input, shape index: {}]   ;;  %s2694_s3 = inlined_call_operand.vmem [shape: f32[64,4], index: 3, kind: input, shape index: {}]   ;;  %s2695_s4 = inlined_call_operand.vmem [shape: f32[4,64], index: 4, kind: input, shape index: {}]   ;;  %s2696_s5 = inlined_call_operand.vmem [shape: f32[64,128], index: 5, kind: input, shape index: {}]   ;;  %s2697_s6 = inlined_call_operand.vmem [shape: f32[1,128], index: 6, kind: input, shape index: {}]   ;;  %s2698_s7 = inlined_call_operand.hbm [shape: f32[2,256,128], index: 7, kind: output, shape index: {}]  }
   0x1   :  { %14 = vsyncpa [#allocation3 + $0x1], 0 }
   0x2   :  { %15 = vsyncpa [#allocation4], 0 }
   0x3   :  { %17 = vsyncpa [#allocation4 + $0x1], 0  ;;  %s1955_s24 = smov 0   ;;  %s1957_s25 = smov 0  }
   0x4   :  { %s1959_s26 = smov 0   ;;  %s1961_s27 = smov 0  }
   0x5 LB: > { %s1976_s28 = sadd.s32 4294967295, %s1904_s27   ;;  %s1371_s29 = sadd.s32 4294967294, %s1904_s27   ;;  %s1904_s27 = sphi %s1961_s27, %s2741_s27   ;;  %s1900_s26 = sphi %s1959_s26, %s2740_s26   ;;  %s1896_s25 = sphi %s1957_s25, %s2739_s25   ;;  %s1892_s24 = sphi %s1955_s24, %s2738_s24  }
   0x6   : > { %s1980_s30 = sadd.s32 1, %s1904_s27   ;;  %s30_s8 = sadd.s32 1, %s1900_s26 }
   0x7   : > { %s27_s9 = ssub.s32 %s1904_s27, %s1980_s30  ;;  %p37_p0 = scmp.ne.s32.totalorder %s1900_s26, %s1896_s25 }
   0x8   : > { %p28_p1 = scmp.eq.s32.totalorder %s27_s9, 0  ;;  %p38_p2 = scmp.eq.s32.totalorder %s1904_s27, 0 }
   0x9   : > { %p43_p3 = scmp.ne.s32.totalorder %s1896_s25, %s1892_s24  ;;  %p44_p4 = scmp.eq.s32.totalorder %s1976_s28, 0 }
   0xa   : > { %s1992_s10 = scalar_select %p28_p1, %s1900_s26, %s30_s8  }
   0xb   : > { %p1994_p5 = por %p38_p2, %p37_p0  ;;  %p1998_p6 = por %p44_p4, %p43_p3 }
   0xc   : > { %p193_p7 = scmp.eq.s32.totalorder %s1976_s28, 1  ;;  %p199_p8 = scmp.eq.s32.totalorder %s1371_s29, 1 }
   0xd   : > { %p1763_p10 = scmp.lt.s32.totalorder %s1904_s27, 2  ;;  %s237_s15 = sand.u32 1, %s1900_s26  }
   0xe   : > { %p2005_p11 = por %p193_p7, %p37_p0  ;;  %p2009_p12 = por %p199_p8, %p43_p3 }
   0xf   : > { %s1422_s16 = sshll.u32 %s1904_s27, 12  ;;  %s1374_s17 = sshll.u32 %s237_s15, 8 }
  0x10   : > { %s2717_s13 = scalar_select %p2005_p11, 1, 0 }
  0x11   : > { %s2718_s14 = scalar_select %p2009_p12, 1, 0 }
  0x12   : > { %s2018_s20 = scalar_lea.hbm %s2691_s0, %s1422_s16  ;;  %s241_s21 = scalar_lea.vmem [#allocation2], %s1374_s17 }
  0x13   : > { %s248_s22 = sshll.u32 %s241_s21, 4  ;;  %p2022_p13 = pnand %p1763_p10, %p1994_p5  ;;  %s2026_s22 = int_to_ptr.vmem [resolvable:$true] %s248_s22 }
  0x14   : > { %s2028_s29 = scalar_lea.sflag [#allocation3], %s237_s15  ;;  %s1808_s8 = scalar_lea.hbm %s2018_s20, 4096 }
  0x15   : > { %p1809_p0 = scmp.ne.s32.totalorder %s2018_s20, %s1808_s8  ;;  %p1810_p1 = pneg %p2022_p13 }
  0x16   : > { %s1813_s16 = scalar_lea.hbm %s2691_s0, 8192  ;;  %p1814_p4 = scmp.lt.u32.totalorder %s2018_s20, %s2691_s0 }
  0x17   : > { %p1811_p2 = pnand %p1810_p1, %p1809_p0  ;;  %p1815_p5 = scmp.lt.u32.totalorder %s1813_s16, %s1808_s8 }
  0x18   : > { %p1817_p8 = scmp.lt.u32.totalorder %s1808_s8, %s2018_s20 }
  0x19   : > { %p1812_p3 = pneg %p1811_p2  ;;  %p1816_p7 = por %p1815_p5, %p1814_p4 }
  0x1b   : > { %p1818_p10 = por %p1817_p8, %p1816_p7 }
  0x1d   : > { %p1819_p9 = pnand %p1818_p10, %p1812_p3 }
  0x1f   : > { %1822 = shalt.err (!%p1819_p9)
}
  0x20   : > { %s1823_s15 = scalar_lea.vmem %s2026_s22, 4096  ;;  %s1906_s19 = smov [#allocation2]  }
  0x21   : > { %p1824_p0 = scmp.ne.s32.totalorder %s2026_s22, %s1823_s15  ;;  %s1828_s21 = sshll.u32 %s1906_s19, 4  ;;  %s1829_s21 = int_to_ptr.vmem [resolvable:$false] %s1828_s21 }
  0x22   : > { %s1830_s9 = scalar_lea.vmem %s1829_s21, 8192  ;;  %p1831_p11 = scmp.lt.s32.totalorder %s2026_s22, %s1829_s21 }
  0x23   : > { %p1826_p2 = pnand %p1824_p0, %p1810_p1  ;;  %p1832_p4 = scmp.lt.s32.totalorder %s1830_s9, %s1823_s15 }
  0x25   : > { %p1827_p12 = pneg %p1826_p2  ;;  %p1833_p5 = por %p1832_p4, %p1831_p11 }
  0x27   : > { %p1834_p7 = pnand %p1833_p5, %p1827_p12 }
  0x29   : > { %1837 = shalt.err (!%p1834_p7)
}
  0x2a   : > { %s1907_s8 = smov 128   ;;  %s1908_s11 = smov 8  }
  0x2b   : > { %1758 = dma.hbm_to_vmem [thread:$0]  (!%p2022_p13), %s2018_s20, 4096, %s2026_s22, %s2028_s29, %s1907_s8, %s1907_s8, %s1908_s11  }
  0x2c   : > { %p1377_p9 = scmp.ge.s32.totalorder %s1904_s27, 1  ;;  %p256_p1 = scmp.lt.s32.totalorder %s1904_s27, 3 }
  0x2e   : > { %p257_p3 = pnand %p1377_p9, %p256_p1 }
  0x2f   : > { %s2059_s16 = sand.u32 (!%p257_p3), 1, %s1896_s25  }
  0x30   : > { %260 = sbr.rel (%p257_p3) target bundleno = 1138 (0x472), region = 48  ;;  %s1378_s17 = sshll.u32 (!%p257_p3), %s2059_s16, 8 }
  0x31   : > { %s263_s18 = scalar_lea.sflag (!%p257_p3), [#allocation3], %s2059_s16  ;;  %s2065_s15 = scalar_lea.vmem (!%p257_p3), [#allocation2], %s1378_s17 }
  0x37   : > { %1883 = dma.done.wait (%p1998_p6), %s263_s18, 4096  }
  0x38   : > { %1885 = vsyncadd (%p1998_p6), %s263_s18, 4294963200  ;;  %v329_v0 = vld [vmem:[%s2692_s1] sm:$0xff]  ;;  %v330_v1 = vld [vmem:[%s2692_s1 + $0x8] sm:$0xff]  ;;  %v1909_v59 = vmov 0.0|0.0   ;;  %vm1910_vm0 = vmmov 0   ;;  %vm609_vm1 = vcmask 523264  }
  0x39   : > { %v331_v2 = vld [vmem:[%s2692_s1 + $0x10] sm:$0xff]  ;;  %v1691_v3 = vpack.c.bf16 %v330_v1, %v329_v0  ;;  %v332_v4 = vld [vmem:[%s2692_s1 + $0x18] sm:$0xff]  ;;  %v333_v6 = vld [vmem:[%s2692_s1 + $0x20] sm:$0xff]  ;;  %1723 = vmatprep.subr.bf16.mxu1 %v1909_v59  ;;  %vm768_vm2 = vcmask 1043456   ;;  %vm764_vm3 = vcmask 31744   ;;  %s2576_s22 = scalar_lea.vmem [#allocation5], %s1378_s17 }
  0x3a   : > { %v1695_v5 = vpack.c.bf16 %v332_v4, %v331_v2  ;;  %v334_v7 = vld [vmem:[%s2692_s1 + $0x28] sm:$0xff]  ;;  %v297_v9 = vld [vmem:[%s2065_s15] sm:$0xff]  ;;  %v335_v10 = vld [vmem:[%s2692_s1 + $0x30] sm:$0xff]  ;;  %v1911_v4 = vmov 0.0   ;;  %s1423_s17 = sshll.u32 %s1976_s28, 12  ;;  %s1298_s23 = sshll.u32 %s2576_s22, 4  ;;  %s2645_s23 = int_to_ptr.vmem [resolvable:$true] %s1298_s23 }
  0x3b   : > { %1692 = vmatprep.subr.bf16.mxu0 %v1691_v3  ;;  %v1699_v8 = vpack.c.bf16 %v334_v7, %v333_v6  ;;  %v336_v11 = vld [vmem:[%s2692_s1 + $0x38] sm:$0xff]  ;;  %1555 = vmatprep.mubr.f32.mxu0 %v297_v9  ;;  %v337_v13 = vld [vmem:[%s2692_s1 + $0x40] sm:$0xff]  ;;  %v338_v14 = vld [vmem:[%s2692_s1 + $0x48] sm:$0xff]  ;;  %s2643_s21 = scalar_lea.hbm %s2698_s7, %s1423_s17  ;;  %s1285_s28 = scalar_lea.sflag [#allocation4], %s2059_s16 }
  0x3c   : > { %1694 = vmatpush3.bf16.msra.mxu0 %v1691_v3  ;;  %v1703_v12 = vpack.c.bf16 %v336_v11, %v335_v10  ;;  %v1707_v15 = vpack.c.bf16 %v338_v14, %v337_v13  ;;  %v339_v16 = vld [vmem:[%s2692_s1 + $0x50] sm:$0xff]  ;;  %v340_v17 = vld [vmem:[%s2692_s1 + $0x58] sm:$0xff]  ;;  %v341_v19 = vld [vmem:[%s2692_s1 + $0x60] sm:$0xff]  ;;  %1619 = vmatprep.mubr.msk.f32.mxu1 %vm1910_vm0, %v1911_v4  ;;  %p2735_p11 = scmp.ne.s32.totalorder %s2717_s13, 0  ;;  %s1912_s9 = smov [#allocation5]  }
  0x3d   : > { %1696 = vmatprep.subr.bf16.mxu0 %v1695_v5  ;;  %v1711_v18 = vpack.c.bf16 %v340_v17, %v339_v16  ;;  %v342_v20 = vld [vmem:[%s2692_s1 + $0x68] sm:$0xff]  ;;  %v343_v22 = vld [vmem:[%s2692_s1 + $0x70] sm:$0xff]  ;;  %v344_v23 = vld [vmem:[%s2692_s1 + $0x78] sm:$0xff]  ;;  %s1842_s8 = sshll.u32 %s1912_s9, 4  ;;  %s1843_s8 = int_to_ptr.vmem [resolvable:$false] %s1842_s8 }
  0x3e   : > { %v1715_v21 = vpack.c.bf16 %v342_v20, %v341_v19  ;;  %v1719_v24 = vpack.c.bf16 %v344_v23, %v343_v22  ;;  %v298_v25 = vld [vmem:[%s2065_s15 + $0x8] sm:$0xff]  ;;  %v299_v26 = vld [vmem:[%s2065_s15 + $0x10] sm:$0xff]  ;;  %v300_v27 = vld [vmem:[%s2065_s15 + $0x18] sm:$0xff]  ;;  %s1844_s12 = scalar_lea.vmem %s1843_s8, 8192  ;;  %p1845_p8 = scmp.lt.s32.totalorder %s2645_s23, %s1843_s8 }
  0x3f   : > { %v301_v28 = vld [vmem:[%s2065_s15 + $0x20] sm:$0xff]  ;;  %v302_v29 = vld [vmem:[%s2065_s15 + $0x28] sm:$0xff]  ;;  %v303_v30 = vld [vmem:[%s2065_s15 + $0x30] sm:$0xff] }
  0x40   : > { %1698 = vmatpush3.bf16.msra.mxu0 %v1695_v5  ;;  %v304_v31 = vld [vmem:[%s2065_s15 + $0x38] sm:$0xff]  ;;  %v305_v32 = vld [vmem:[%s2065_s15 + $0x40] sm:$0xff]  ;;  %v306_v33 = vld [vmem:[%s2065_s15 + $0x48] sm:$0xff] }
  0x41   : > { %1700 = vmatprep.subr.bf16.mxu0 %v1699_v8  ;;  %v307_v34 = vld [vmem:[%s2065_s15 + $0x50] sm:$0xff]  ;;  %v308_v35 = vld [vmem:[%s2065_s15 + $0x58] sm:$0xff]  ;;  %v309_v36 = vld [vmem:[%s2065_s15 + $0x60] sm:$0xff] }
  0x42   : > { %v310_v37 = vld [vmem:[%s2065_s15 + $0x68] sm:$0xff]  ;;  %v311_v38 = vld [vmem:[%s2065_s15 + $0x70] sm:$0xff]  ;;  %v312_v39 = vld [vmem:[%s2065_s15 + $0x78] sm:$0xff] }
  0x43   : > { %v313_v40 = vld [vmem:[%s2065_s15 + $0x80] sm:$0xff]  ;;  %v314_v41 = vld [vmem:[%s2065_s15 + $0x88] sm:$0xff]  ;;  %v315_v42 = vld [vmem:[%s2065_s15 + $0x90] sm:$0xff] }
  0x44   : > { %1702 = vmatpush3.bf16.msra.mxu0 %v1699_v8  ;;  %v316_v43 = vld [vmem:[%s2065_s15 + $0x98] sm:$0xff]  ;;  %v317_v44 = vld [vmem:[%s2065_s15 + $0xa0] sm:$0xff]  ;;  %v318_v45 = vld [vmem:[%s2065_s15 + $0xa8] sm:$0xff] }
  0x45   : > { %1704 = vmatprep.subr.bf16.mxu0 %v1703_v12  ;;  %v319_v46 = vld [vmem:[%s2065_s15 + $0xb0] sm:$0xff]  ;;  %v320_v47 = vld [vmem:[%s2065_s15 + $0xb8] sm:$0xff]  ;;  %v321_v48 = vld [vmem:[%s2065_s15 + $0xc0] sm:$0xff] }
  0x46   : > { %v322_v49 = vld [vmem:[%s2065_s15 + $0xc8] sm:$0xff]  ;;  %v323_v50 = vld [vmem:[%s2065_s15 + $0xd0] sm:$0xff]  ;;  %v324_v51 = vld [vmem:[%s2065_s15 + $0xd8] sm:$0xff] }
  0x47   : > { %v325_v52 = vld [vmem:[%s2065_s15 + $0xe0] sm:$0xff]  ;;  %v326_v53 = vld [vmem:[%s2065_s15 + $0xe8] sm:$0xff]  ;;  %v327_v54 = vld [vmem:[%s2065_s15 + $0xf0] sm:$0xff] }
  0x48   : > { %1706 = vmatpush3.bf16.msra.mxu0 %v1703_v12  ;;  %v328_v55 = vld [vmem:[%s2065_s15 + $0xf8] sm:$0xff]  ;;  %v681_v56 = vld [vmem:[%s2694_s3] sm:$0xff]  ;;  %v682_v57 = vld [vmem:[%s2694_s3 + $0x8] sm:$0xff]  ;;  %s1838_s15 = scalar_lea.vmem %s2645_s23, 4096 }
  0x49   : > { %1708 = vmatprep.subr.bf16.mxu0 %v1707_v15  ;;  %v1724_v58 = vpack.c.bf16 %v682_v57, %v681_v56  ;;  %v683_v60 = vld [vmem:[%s2694_s3 + $0x10] sm:$0xff]  ;;  %v684_v61 = vld [vmem:[%s2694_s3 + $0x18] sm:$0xff]  ;;  %v685_v63 = vld [vmem:[%s2694_s3 + $0x20] sm:$0xff]  ;;  %p1839_p6 = scmp.ne.s32.totalorder %s2645_s23, %s1838_s15  ;;  %p1846_p10 = scmp.lt.s32.totalorder %s1844_s12, %s1838_s15 }
  0x4a   : > { %v1727_v62 = vpack.c.bf16 %v684_v61, %v683_v60  ;;  %v686_v0 = vld [vmem:[%s2694_s3 + $0x28] sm:$0xff]  ;;  %v687_v1 = vld [vmem:[%s2694_s3 + $0x30] sm:$0xff]  ;;  %v688_v3 = vld [vmem:[%s2694_s3 + $0x38] sm:$0xff] }
  0x4b   : > { %1725 = vmatpush3.bf16.msra.mxu1 %v1724_v58  ;;  %v1730_v2 = vpack.c.bf16 %v686_v0, %v685_v63  ;;  %v1733_v5 = vpack.c.bf16 %v688_v3, %v687_v1  ;;  %v2181_v6 = vld [vmem:[%s2693_s2] ss:$0 sm:$0xff]  ;;  %p1840_p12 = pnand %p1839_p6, %p2735_p11  ;;  %p1847_p0 = por %p1846_p10, %p1845_p8 }
  0x4c   : > { %1710 = vmatpush3.bf16.msra.mxu0 %v1707_v15  ;;  %1726 = vmatprep.subr.bf16.mxu1 %v1909_v59 }
  0x4d   : > { %1712 = vmatprep.subr.bf16.mxu0 %v1711_v18  ;;  %p1841_p13 = pneg %p1840_p12 }
  0x4f   : > { %1728 = vmatpush3.bf16.msra.mxu1 %v1727_v62  ;;  %p1848_p2 = pnand %p1847_p0, %p1841_p13 }
  0x50   : > { %1714 = vmatpush3.bf16.msra.mxu0 %v1711_v18  ;;  %1729 = vmatprep.subr.bf16.mxu1 %v1909_v59 }
  0x51   : > { %1716 = vmatprep.subr.bf16.mxu0 %v1715_v21 }
  0x53   : > { %1731 = vmatpush3.bf16.msra.mxu1 %v1730_v2 }
  0x54   : > { %1718 = vmatpush3.bf16.msra.mxu0 %v1715_v21  ;;  %1732 = vmatprep.subr.bf16.mxu1 %v1909_v59 }
  0x55   : > { %1720 = vmatprep.subr.bf16.mxu0 %v1719_v24 }
  0x57   : > { %1734 = vmatpush3.bf16.msra.mxu1 %v1733_v5 }
  0x58   : > { %1722 = vmatpush3.bf16.msra.mxu0 %v1719_v24  ;;  %1622 = vmatprep.subr.mxu1 %v1911_v4 }
  0x5b   : > { %1556 = vmatmul.mubr.f32.vlgmr.msra.gmra.mrb[0].mxu0 %v298_v25 }
  0x5c   : > { %1558 = vmatprep.mubr.f32.mxu0 %v299_v26 }
  0x5f   : > { %1559 = vmatmul.mubr.f32.gmra.mrb[2].mxu0 %v300_v27 }
  0x60   : > { %1561 = vmatprep.mubr.f32.mxu0 %v301_v28 }
  0x63   : > { %1562 = vmatmul.mubr.f32.gmra.mrb[4].mxu0 %v302_v29 }
  0x64   : > { %1564 = vmatprep.mubr.f32.mxu0 %v303_v30 }
  0x67   : > { %1565 = vmatmul.mubr.f32.gmra.mrb[6].mxu0 %v304_v31 }
  0x68   : > { %1567 = vmatprep.mubr.f32.mxu0 %v305_v32 }
  0x6b   : > { %1568 = vmatmul.mubr.f32.gmra.mrb[8].mxu0 %v306_v33 }
  0x6c   : > { %1570 = vmatprep.mubr.f32.mxu0 %v307_v34 }
  0x6f   : > { %1571 = vmatmul.mubr.f32.gmra.mrb[10].mxu0 %v308_v35 }
  0x70   : > { %1573 = vmatprep.mubr.f32.mxu0 %v309_v36 }
  0x73   : > { %1574 = vmatmul.mubr.f32.gmra.mrb[12].mxu0 %v310_v37 }
  0x74   : > { %1576 = vmatprep.mubr.f32.mxu0 %v311_v38 }
  0x77   : > { %1577 = vmatmul.mubr.f32.gmra.mrb[14].mxu0 %v312_v39 }
  0x78   : > { %1579 = vmatprep.mubr.f32.mxu0 %v313_v40 }
  0x7b   : > { %1580 = vmatmul.mubr.f32.gmra.mrb[16].mxu0 %v314_v41 }
  0x7c   : > { %1582 = vmatprep.mubr.f32.mxu0 %v315_v42 }
  0x7f   : > { %1583 = vmatmul.mubr.f32.gmra.mrb[18].mxu0 %v316_v43 }
  0x80   : > { %1585 = vmatprep.mubr.f32.mxu0 %v317_v44 }
  0x83   : > { %1586 = vmatmul.mubr.f32.gmra.mrb[20].mxu0 %v318_v45 }
  0x84   : > { %1588 = vmatprep.mubr.f32.mxu0 %v319_v46 }
  0x87   : > { %1589 = vmatmul.mubr.f32.gmra.mrb[22].mxu0 %v320_v47 }
  0x88   : > { %1591 = vmatprep.mubr.f32.mxu0 %v321_v48 }
  0x8b   : > { %1592 = vmatmul.mubr.f32.gmra.mrb[24].mxu0 %v322_v49 }
  0x8c   : > { %1594 = vmatprep.mubr.f32.mxu0 %v323_v50 }
  0x8f   : > { %1595 = vmatmul.mubr.f32.gmra.mrb[26].mxu0 %v324_v51 }
  0x90   : > { %1597 = vmatprep.mubr.f32.mxu0 %v325_v52 }
  0x93   : > { %1598 = vmatmul.mubr.f32.gmra.mrb[28].mxu0 %v326_v53 }
  0x94   : > { %1600 = vmatprep.mubr.f32.mxu0 %v327_v54 }
  0x97   : > { %1601 = vmatmul.mubr.f32.gmra.mrb[30].mxu0 %v328_v55 }
 0x12e   : > { %v1557_v7 = vpop.f32.mrb[0].mxu0 }
 0x12f   : > { %v2184_v8 = vadd.f32 %v1557_v7, %v2181_v6  ;;  %v418_v9 = vpop.f32.mrb[1].mxu0 }
 0x130   : > { %v2187_v10 = vadd.f32 %v2181_v6, %v418_v9 }
 0x131   : > { %v578_v11 = vmax.f32 %v2184_v8, 0.0 }
 0x132   : > { %v577_v12 = vmax.f32 %v2187_v10, 0.0  ;;  %v1560_v13 = vpop.f32.mrb[2].mxu0 }
 0x133   : > { %v2192_v14 = vadd.f32 %v1560_v13, %v2181_v6  ;;  %v428_v15 = vpop.f32.mrb[3].mxu0  ;;  %v611_v16 = vsel %vm609_vm1, %v578_v11, 0.0 }
 0x134   : > { %v610_v17 = vsel %vm609_vm1, %v577_v12, 0.0  ;;  %v2201_v18 = vadd.f32 %v2181_v6, %v428_v15 }
 0x135   : > { %v580_v19 = vmax.f32 %v2192_v14, 0.0  ;;  %v612_v22 = vadd.f32 %v611_v16, %v610_v17 }
 0x136   : > { %v579_v20 = vmax.f32 %v2201_v18, 0.0  ;;  %v1563_v21 = vpop.f32.mrb[4].mxu0 }
 0x137   : > { %v2206_v23 = vadd.f32 %v1563_v21, %v2181_v6  ;;  %v438_v24 = vpop.f32.mrb[5].mxu0  ;;  %v615_v28 = vsel %vm609_vm1, %v580_v19, 0.0 }
 0x138   : > { %v613_v25 = vsel %vm609_vm1, %v579_v20, 0.0  ;;  %v2212_v26 = vadd.f32 %v2181_v6, %v438_v24 }
 0x139   : > { %v614_v27 = vadd.f32 %v613_v25, %v612_v22  ;;  %v582_v29 = vmax.f32 %v2206_v23, 0.0 }
 0x13a   : > { %v581_v30 = vmax.f32 %v2212_v26, 0.0  ;;  %v1566_v31 = vpop.f32.mrb[6].mxu0 }
 0x13b   : > { %v616_v32 = vadd.f32 %v615_v28, %v614_v27  ;;  %v2220_v33 = vadd.f32 %v1566_v31, %v2181_v6  ;;  %v448_v34 = vpop.f32.mrb[7].mxu0  ;;  %v619_v38 = vsel %vm609_vm1, %v582_v29, 0.0 }
 0x13c   : > { %v617_v35 = vsel %vm609_vm1, %v581_v30, 0.0  ;;  %v2226_v36 = vadd.f32 %v2181_v6, %v448_v34 }
 0x13d   : > { %v618_v37 = vadd.f32 %v617_v35, %v616_v32  ;;  %v584_v39 = vmax.f32 %v2220_v33, 0.0 }
 0x13e   : > { %v583_v40 = vmax.f32 %v2226_v36, 0.0  ;;  %v1569_v41 = vpop.f32.mrb[8].mxu0 }
 0x13f   : > { %v620_v42 = vadd.f32 %v619_v38, %v618_v37  ;;  %v2234_v43 = vadd.f32 %v1569_v41, %v2181_v6  ;;  %v458_v44 = vpop.f32.mrb[9].mxu0  ;;  %v623_v48 = vsel %vm609_vm1, %v584_v39, 0.0 }
 0x140   : > { %v621_v45 = vsel %vm609_vm1, %v583_v40, 0.0  ;;  %v2240_v46 = vadd.f32 %v2181_v6, %v458_v44 }
 0x141   : > { %v622_v47 = vadd.f32 %v621_v45, %v620_v42  ;;  %v586_v49 = vmax.f32 %v2234_v43, 0.0 }
 0x142   : > { %v585_v50 = vmax.f32 %v2240_v46, 0.0  ;;  %v1572_v51 = vpop.f32.mrb[10].mxu0 }
 0x143   : > { %v624_v52 = vadd.f32 %v623_v48, %v622_v47  ;;  %v2248_v53 = vadd.f32 %v1572_v51, %v2181_v6  ;;  %v468_v54 = vpop.f32.mrb[11].mxu0  ;;  %v627_v58 = vsel %vm609_vm1, %v586_v49, 0.0 }
 0x144   : > { %v625_v55 = vsel %vm609_vm1, %v585_v50, 0.0  ;;  %v2254_v56 = vadd.f32 %v2181_v6, %v468_v54 }
 0x145   : > { %v626_v57 = vadd.f32 %v625_v55, %v624_v52  ;;  %v588_v59 = vmax.f32 %v2248_v53, 0.0 }
 0x146   : > { %v587_v60 = vmax.f32 %v2254_v56, 0.0  ;;  %v1575_v61 = vpop.f32.mrb[12].mxu0 }
 0x147   : > { %v628_v62 = vadd.f32 %v627_v58, %v626_v57  ;;  %v2262_v63 = vadd.f32 %v1575_v61, %v2181_v6  ;;  %v478_v0 = vpop.f32.mrb[13].mxu0  ;;  %v631_v5 = vsel %vm609_vm1, %v588_v59, 0.0 }
 0x148   : > { %v629_v1 = vsel %vm609_vm1, %v587_v60, 0.0  ;;  %v2268_v2 = vadd.f32 %v2181_v6, %v478_v0 }
 0x149   : > { %v630_v3 = vadd.f32 %v629_v1, %v628_v62  ;;  %v590_v7 = vmax.f32 %v2262_v63, 0.0 }
 0x14a   : > { %v589_v9 = vmax.f32 %v2268_v2, 0.0  ;;  %v1578_v13 = vpop.f32.mrb[14].mxu0 }
 0x14b   : > { %v632_v15 = vadd.f32 %v631_v5, %v630_v3  ;;  %v2276_v16 = vadd.f32 %v1578_v13, %v2181_v6  ;;  %v488_v17 = vpop.f32.mrb[15].mxu0  ;;  %v635_v25 = vsel %vm609_vm1, %v590_v7, 0.0 }
 0x14c   : > { %v633_v21 = vsel %vm609_vm1, %v589_v9, 0.0  ;;  %v2282_v22 = vadd.f32 %v2181_v6, %v488_v17 }
 0x14d   : > { %v634_v24 = vadd.f32 %v633_v21, %v632_v15  ;;  %v2714_v27 = vmax.f32 %v2276_v16, 0.0  ;;  %v2720_v33 = vmax.f32 %v2276_v16, 0.0 }
 0x14e   : > { %v591_v28 = vmax.f32 %v2282_v22, 0.0  ;;  %v1581_v31 = vpop.f32.mrb[16].mxu0 }
 0x14f   : > { %v636_v32 = vadd.f32 %v635_v25, %v634_v24  ;;  %v2290_v34 = vadd.f32 %v1581_v31, %v2181_v6  ;;  %v498_v35 = vpop.f32.mrb[17].mxu0  ;;  %v639_v42 = vsel %vm609_vm1, %v2714_v27, 0.0 }
 0x150   : > { %v637_v37 = vsel %vm609_vm1, %v591_v28, 0.0  ;;  %v2296_v38 = vadd.f32 %v2181_v6, %v498_v35 }
 0x151   : > { %v638_v41 = vadd.f32 %v637_v37, %v636_v32  ;;  %v2711_v44 = vmax.f32 %v2290_v34, 0.0  ;;  %v2722_v43 = vmax.f32 %v2290_v34, 0.0 }
 0x152   : > { %v2713_v45 = vmax.f32 %v2296_v38, 0.0  ;;  %v1584_v47 = vpop.f32.mrb[18].mxu0 }
 0x153   : > { %v640_v48 = vadd.f32 %v639_v42, %v638_v41  ;;  %v2304_v51 = vadd.f32 %v1584_v47, %v2181_v6  ;;  %v508_v52 = vpop.f32.mrb[19].mxu0  ;;  %v643_v58 = vsel %vm609_vm1, %v2711_v44, 0.0 }
 0x154   : > { %v641_v54 = vsel %vm609_vm1, %v2713_v45, 0.0  ;;  %v2310_v55 = vadd.f32 %v2181_v6, %v508_v52 }
 0x155   : > { %v642_v57 = vadd.f32 %v641_v54, %v640_v48  ;;  %v2706_v61 = vmax.f32 %v2304_v51, 0.0  ;;  %v2724_v53 = vmax.f32 %v2304_v51, 0.0 }
 0x156   : > { %v2709_v62 = vmax.f32 %v2310_v55, 0.0  ;;  %v1587_v0 = vpop.f32.mrb[20].mxu0 }
 0x157   : > { %v644_v1 = vadd.f32 %v643_v58, %v642_v57  ;;  %v2318_v3 = vadd.f32 %v1587_v0, %v2181_v6  ;;  %v518_v5 = vpop.f32.mrb[21].mxu0  ;;  %v647_v21 = vsel %vm609_vm1, %v2706_v61, 0.0 }
 0x158   : > { %v645_v13 = vsel %vm609_vm1, %v2709_v62, 0.0  ;;  %v2324_v15 = vadd.f32 %v2181_v6, %v518_v5 }
 0x159   : > { %v646_v17 = vadd.f32 %v645_v13, %v644_v1  ;;  %v2702_v24 = vmax.f32 %v2318_v3, 0.0  ;;  %v2726_v63 = vmax.f32 %v2318_v3, 0.0 }
 0x15a   : > { %v2705_v25 = vmax.f32 %v2324_v15, 0.0  ;;  %v1590_v31 = vpop.f32.mrb[22].mxu0 }
 0x15b   : > { %v648_v32 = vadd.f32 %v647_v21, %v646_v17  ;;  %v2332_v35 = vadd.f32 %v1590_v31, %v2181_v6  ;;  %v528_v37 = vpop.f32.mrb[23].mxu0  ;;  %v651_v48 = vsel %vm609_vm1, %v2702_v24, 0.0 }
 0x15c   : > { %v649_v41 = vsel %vm609_vm1, %v2705_v25, 0.0  ;;  %v2338_v42 = vadd.f32 %v2181_v6, %v528_v37 }
 0x15d   : > { %v650_v47 = vadd.f32 %v649_v41, %v648_v32  ;;  %v2700_v52 = vmax.f32 %v2332_v35, 0.0  ;;  %v2728_v16 = vmax.f32 %v2332_v35, 0.0 }
 0x15e   : > { %v2701_v54 = vmax.f32 %v2338_v42, 0.0  ;;  %v1593_v57 = vpop.f32.mrb[24].mxu0 }
 0x15f   : > { %v652_v58 = vadd.f32 %v651_v48, %v650_v47  ;;  %v2346_v0 = vadd.f32 %v1593_v57, %v2181_v6  ;;  %v538_v1 = vpop.f32.mrb[25].mxu0  ;;  %v655_v21 = vsel %vm609_vm1, %v2700_v52, 0.0 }
 0x160   : > { %v653_v5 = vsel %vm609_vm1, %v2701_v54, 0.0  ;;  %v2352_v13 = vadd.f32 %v2181_v6, %v538_v1 }
 0x161   : > { %v654_v17 = vadd.f32 %v653_v5, %v652_v58  ;;  %v2703_v31 = vmax.f32 %v2346_v0, 0.0 }
 0x162   : > { %v2704_v32 = vmax.f32 %v2352_v13, 0.0  ;;  %v1596_v37 = vpop.f32.mrb[26].mxu0 }
 0x163   : > { %v656_v41 = vadd.f32 %v655_v21, %v654_v17  ;;  %v2360_v47 = vadd.f32 %v1596_v37, %v2181_v6  ;;  %v548_v48 = vpop.f32.mrb[27].mxu0  ;;  %v659_v5 = vsel %vm609_vm1, %v2703_v31, 0.0 }
 0x164   : > { %v657_v57 = vsel %vm609_vm1, %v2704_v32, 0.0  ;;  %v2366_v58 = vadd.f32 %v2181_v6, %v548_v48 }
 0x165   : > { %v658_v1 = vadd.f32 %v657_v57, %v656_v41  ;;  %v2707_v52 = vmax.f32 %v2360_v47, 0.0 }
 0x166   : > { %v2708_v17 = vmax.f32 %v2366_v58, 0.0  ;;  %v1599_v21 = vpop.f32.mrb[28].mxu0 }
 0x167   : > { %v660_v37 = vadd.f32 %v659_v5, %v658_v1  ;;  %v2374_v54 = vadd.f32 %v1599_v21, %v2181_v6  ;;  %v558_v24 = vpop.f32.mrb[29].mxu0  ;;  %v663_v31 = vsel %vm609_vm1, %v2707_v52, 0.0 }
 0x168   : > { %v661_v48 = vsel %vm609_vm1, %v2708_v17, 0.0  ;;  %v2380_v41 = vadd.f32 %v2181_v6, %v558_v24 }
 0x169   : > { %v662_v57 = vadd.f32 %v661_v48, %v660_v37  ;;  %v2712_v32 = vmax.f32 %v2374_v54, 0.0 }
 0x16a   : > { %v2710_v1 = vmax.f32 %v2380_v41, 0.0  ;;  %v1602_v5 = vpop.f32.mrb[30].mxu0 }
 0x16b   : > { %v664_v21 = vadd.f32 %v663_v31, %v662_v57  ;;  %v2388_v25 = vadd.f32 %v1602_v5, %v2181_v6  ;;  %v568_v61 = vpop.f32.mrb[31].mxu0  ;;  %v667_v52 = vsel %vm609_vm1, %v2712_v32, 0.0 }
 0x16c   : > { %v665_v24 = vsel %vm609_vm1, %v2710_v1, 0.0  ;;  %v2394_v37 = vadd.f32 %v2181_v6, %v568_v61 }
 0x16d   : > { %v666_v48 = vadd.f32 %v665_v24, %v664_v21  ;;  %v608_v17 = vmax.f32 %v2388_v25, 0.0 }
 0x16e   : > { %v607_v31 = vmax.f32 %v2394_v37, 0.0 }
 0x16f   : > { %v668_v57 = vadd.f32 %v667_v52, %v666_v48  ;;  %v671_v6 = vsel %vm609_vm1, %v608_v17, 0.0  ;;  %v763_v52 = vld [vmem:[%s2695_s4] sm:$0xf] }
 0x170   : > { %v669_v5 = vsel %vm609_vm1, %v607_v31, 0.0 }
 0x171   : > { %v670_v62 = vadd.f32 %v669_v5, %v668_v57  ;;  %v888_v5 = vld [vmem:[%s2696_s5 + $0x20] sm:$0xff] }
 0x173   : > { %v672_v61 = vadd.f32 %v671_v6, %v670_v62  ;;  %v889_v6 = vld [vmem:[%s2696_s5 + $0x28] sm:$0xff] }
 0x175   : > { %v673_v21 = vrot.slane %v672_v61, 4 }
 0x177   : > { %v674_v24 = vadd.f32 %v673_v21, %v672_v61  ;;  %v1743_v61 = vpack.c.bf16 %v889_v6, %v888_v5  ;;  %v890_v21 = vld [vmem:[%s2696_s5 + $0x30] sm:$0xff] }
 0x179   : > { %v675_v1 = vrot.slane %v674_v24, 2 }
 0x17b   : > { %v676_v44 = vadd.f32 %v675_v1, %v674_v24  ;;  %v891_v24 = vld [vmem:[%s2696_s5 + $0x38] sm:$0xff] }
 0x17d   : > { %v677_v32 = vrot.slane %v676_v44, 1 }
 0x17f   : > { %v678_v45 = vadd.f32 %v677_v32, %v676_v44  ;;  %v884_v44 = vld [vmem:[%s2696_s5] sm:$0xff] }
 0x181   : > { %v680_v27 = vmul.f32 0.00390625, %v678_v45  ;;  %v885_v45 = vld [vmem:[%s2696_s5 + $0x8] sm:$0xff] }
 0x182   : > { %v1735_v32 = vpack.c.bf16 %v885_v45, %v884_v44 }
 0x183   : > { %1620 = vmatmul.mubr.msk.f32.vlgmr.msra.gmra.mrb[0].mxu1 %vm609_vm1, %v680_v27  ;;  %v887_v27 = vld [vmem:[%s2696_s5 + $0x18] sm:$0xff] }
 0x184   : > { %1623 = vmatpush3.msk.msra.mxu1 %vm768_vm2, %v763_v52  ;;  %1624 = vmatprep.mubr.msk.f32.mxu1 %vm1910_vm0, %v1911_v4  ;;  %v886_v4 = vld [vmem:[%s2696_s5 + $0x10] sm:$0xff]  ;;  %v1747_v52 = vpack.c.bf16 %v891_v24, %v890_v21 }
 0x185   : > { %1736 = vmatprep.subr.bf16.mxu1 %v1735_v32  ;;  %v1739_v1 = vpack.c.bf16 %v887_v27, %v886_v4  ;;  %v848_v4 = vlaneseq }
 0x187   : > { %v849_v27 = vshrl.u32 %v848_v4, 7 }
 0x256   : > { %v758_v48 = vpop.f32.mrb[0].mxu1 }
 0x257   : > { %v762_v62 = vmax.f32 %v758_v48, 0.0  ;;  %v1621_v57 = vpop.f32.mrb[1].mxu1 }
 0x259   : > { %1625 = vmatmul.mubr.msk.f32.vlgmr.msra.gmra.mrb[2].mxu1 %vm764_vm3, %v762_v62 }
 0x25a   : > { %1738 = vmatpush3.bf16.msra.mxu1 %v1735_v32 }
 0x25b   : > { %1740 = vmatprep.subr.bf16.mxu1 %v1739_v1 }
 0x25e   : > { %1742 = vmatpush3.bf16.msra.mxu1 %v1739_v1  ;;  %v850_v1 = vsub.s32 0, %v849_v27 }
 0x25f   : > { %1744 = vmatprep.subr.bf16.mxu1 %v1743_v61 }
 0x262   : > { %1746 = vmatpush3.bf16.msra.mxu1 %v1743_v61 }
 0x263   : > { %1748 = vmatprep.subr.bf16.mxu1 %v1747_v52 }
 0x266   : > { %1750 = vmatpush3.bf16.msra.mxu1 %v1747_v52 }
 0x32c   : > { %v838_v48 = vpop.f32.mrb[2].mxu1 }
 0x32d   : > { %v842_v62 = vsub.f32 0.0, %v838_v48  ;;  %v1626_v57 = vpop.f32.mrb[3].mxu1 }
 0x32f   : > { %v843_v44 = vmul.f32 1.442695, %v842_v62 }
 0x331   : > { %1804 = vpow2.f32 %v843_v44 }
 0x33b   : > { %v1805_v45 = vpop.eup %1804 }
 0x33c   : > { %v845_v32 = vadd.f32 1.0, %v1805_v45 }
 0x33e   : > { %1806 = vrcp.f32 %v845_v32 }
 0x348   : > { %v1807_v5 = vpop.eup %1806 }
 0x349   : > { %v2437_v6 = vrot.slane %v1807_v5, %v850_v1 }
 0x34b   : > { %v852_v61 = vmul.f32 %v2437_v6, %v577_v12  ;;  %v853_v21 = vmul.f32 %v2437_v6, %v578_v11  ;;  %v854_v24 = vmul.f32 %v2437_v6, %v579_v20  ;;  %v855_v10 = vmul.f32 %v2437_v6, %v580_v19 }
 0x34c   : > { %v856_v8 = vmul.f32 %v2437_v6, %v581_v30  ;;  %v857_v11 = vmul.f32 %v2437_v6, %v582_v29  ;;  %v858_v12 = vmul.f32 %v2437_v6, %v583_v40  ;;  %v859_v14 = vmul.f32 %v2437_v6, %v584_v39 }
 0x34d   : > { %1643 = vmatprep.mubr.msk.f32.mxu1 %vm609_vm1, %v852_v61  ;;  %v860_v18 = vmul.f32 %v2437_v6, %v585_v50  ;;  %v861_v19 = vmul.f32 %v2437_v6, %v586_v49  ;;  %v862_v20 = vmul.f32 %v2437_v6, %v587_v60  ;;  %v863_v23 = vmul.f32 %v2437_v6, %v588_v59 }
 0x34e   : > { %1644 = vmatmul.mubr.msk.f32.vlgmr.msra.gmra.mrb[4].mxu1 %vm609_vm1, %v853_v21  ;;  %v864_v26 = vmul.f32 %v2437_v6, %v589_v9  ;;  %v865_v29 = vmul.f32 %v2437_v6, %v590_v7  ;;  %v866_v30 = vmul.f32 %v2437_v6, %v591_v28  ;;  %v867_v36 = vmul.f32 %v2437_v6, %v2720_v33 }
 0x34f   : > { %1646 = vmatprep.mubr.msk.f32.mxu1 %vm609_vm1, %v854_v24  ;;  %v2721_v39 = vmax.f32 %v2296_v38, 0.0  ;;  %v869_v46 = vmul.f32 %v2437_v6, %v2722_v43  ;;  %v2723_v49 = vmax.f32 %v2310_v55, 0.0  ;;  %v871_v56 = vmul.f32 %v2437_v6, %v2724_v53 }
 0x350   : > { %v2725_v59 = vmax.f32 %v2324_v15, 0.0  ;;  %v873_v2 = vmul.f32 %v2437_v6, %v2726_v63  ;;  %v2727_v7 = vmax.f32 %v2338_v42, 0.0  ;;  %v875_v22 = vmul.f32 %v2437_v6, %v2728_v16 }
 0x351   : > { %v868_v40 = vmul.f32 %v2437_v6, %v2721_v39  ;;  %v870_v50 = vmul.f32 %v2437_v6, %v2723_v49  ;;  %v2729_v28 = vmax.f32 %v2352_v13, 0.0  ;;  %v2730_v38 = vmax.f32 %v2346_v0, 0.0 }
 0x352   : > { %1647 = vmatmul.mubr.msk.f32.gmra.mrb[6].mxu1 %vm609_vm1, %v855_v10  ;;  %v872_v60 = vmul.f32 %v2437_v6, %v2725_v59  ;;  %v874_v9 = vmul.f32 %v2437_v6, %v2727_v7  ;;  %v2731_v55 = vmax.f32 %v2366_v58, 0.0  ;;  %v2732_v15 = vmax.f32 %v2360_v47, 0.0 }
 0x353   : > { %1649 = vmatprep.mubr.msk.f32.mxu1 %vm609_vm1, %v856_v8  ;;  %v876_v34 = vmul.f32 %v2437_v6, %v2729_v28  ;;  %v877_v51 = vmul.f32 %v2437_v6, %v2730_v38  ;;  %v2733_v42 = vmax.f32 %v2380_v41, 0.0  ;;  %v2734_v0 = vmax.f32 %v2374_v54, 0.0  ;;  %v2570_v54 = vld [vmem:[%s2697_s6] ss:$0 sm:$0xff] }
 0x354   : > { %v878_v3 = vmul.f32 %v2437_v6, %v2731_v55  ;;  %v879_v35 = vmul.f32 %v2437_v6, %v2732_v15  ;;  %v882_v52 = vmul.f32 %v2437_v6, %v607_v31  ;;  %v883_v47 = vmul.f32 %v2437_v6, %v608_v17 }
 0x355   : > { %v880_v13 = vmul.f32 %v2437_v6, %v2733_v42  ;;  %v881_v58 = vmul.f32 %v2437_v6, %v2734_v0 }
 0x356   : > { %1650 = vmatmul.mubr.msk.f32.gmra.mrb[8].mxu1 %vm609_vm1, %v857_v11 }
 0x357   : > { %1652 = vmatprep.mubr.msk.f32.mxu1 %vm609_vm1, %v858_v12 }
 0x35a   : > { %1653 = vmatmul.mubr.msk.f32.gmra.mrb[10].mxu1 %vm609_vm1, %v859_v14 }
 0x35b   : > { %1655 = vmatprep.mubr.msk.f32.mxu1 %vm609_vm1, %v860_v18 }
 0x35e   : > { %1656 = vmatmul.mubr.msk.f32.gmra.mrb[12].mxu1 %vm609_vm1, %v861_v19 }
 0x35f   : > { %1658 = vmatprep.mubr.msk.f32.mxu1 %vm609_vm1, %v862_v20 }
 0x362   : > { %1659 = vmatmul.mubr.msk.f32.gmra.mrb[14].mxu1 %vm609_vm1, %v863_v23 }
 0x363   : > { %1661 = vmatprep.mubr.msk.f32.mxu1 %vm609_vm1, %v864_v26 }
 0x366   : > { %1662 = vmatmul.mubr.msk.f32.gmra.mrb[16].mxu1 %vm609_vm1, %v865_v29 }
 0x367   : > { %1664 = vmatprep.mubr.msk.f32.mxu1 %vm609_vm1, %v866_v30 }
 0x36a   : > { %1665 = vmatmul.mubr.msk.f32.gmra.mrb[18].mxu1 %vm609_vm1, %v867_v36 }
 0x36b   : > { %1667 = vmatprep.mubr.msk.f32.mxu1 %vm609_vm1, %v868_v40 }
 0x36e   : > { %1668 = vmatmul.mubr.msk.f32.gmra.mrb[20].mxu1 %vm609_vm1, %v869_v46 }
 0x36f   : > { %1670 = vmatprep.mubr.msk.f32.mxu1 %vm609_vm1, %v870_v50 }
 0x372   : > { %1671 = vmatmul.mubr.msk.f32.gmra.mrb[22].mxu1 %vm609_vm1, %v871_v56 }
 0x373   : > { %1673 = vmatprep.mubr.msk.f32.mxu1 %vm609_vm1, %v872_v60 }
 0x376   : > { %1674 = vmatmul.mubr.msk.f32.gmra.mrb[24].mxu1 %vm609_vm1, %v873_v2 }
 0x377   : > { %1676 = vmatprep.mubr.msk.f32.mxu1 %vm609_vm1, %v874_v9 }
 0x37a   : > { %1677 = vmatmul.mubr.msk.f32.gmra.mrb[26].mxu1 %vm609_vm1, %v875_v22 }
 0x37b   : > { %1679 = vmatprep.mubr.msk.f32.mxu1 %vm609_vm1, %v876_v34 }
 0x37e   : > { %1680 = vmatmul.mubr.msk.f32.gmra.mrb[28].mxu1 %vm609_vm1, %v877_v51 }
 0x37f   : > { %1682 = vmatprep.mubr.msk.f32.mxu1 %vm609_vm1, %v878_v3 }
 0x382   : > { %1683 = vmatmul.mubr.msk.f32.gmra.mrb[30].mxu1 %vm609_vm1, %v879_v35 }
 0x383   : > { %1685 = vmatprep.mubr.msk.f32.mxu1 %vm609_vm1, %v880_v13 }
 0x386   : > { %1686 = vmatmul.mubr.msk.f32.gmra.mrb[32].mxu1 %vm609_vm1, %v881_v58 }
 0x387   : > { %1688 = vmatprep.mubr.msk.f32.mxu1 %vm609_vm1, %v882_v52 }
 0x38a   : > { %1689 = vmatmul.mubr.msk.f32.gmra.mrb[34].mxu1 %vm609_vm1, %v883_v47 }
 0x421   : > { %v1645_v41 = vpop.f32.mrb[4].mxu1 }
 0x422   : > { %v1067_v37 = vadd.f32 %v1645_v41, %v2570_v54  ;;  %v1061_v48 = vpop.f32.mrb[5].mxu1 }
 0x423   : > { %v1062_v31 = vadd.f32 %v2570_v54, %v1061_v48 }
 0x424   : > { %v1221_v62 = vmax.f32 %v1067_v37, 0.0 }
 0x425   : > { %v1220_v57 = vmax.f32 %v1062_v31, 0.0  ;;  %v1648_v44 = vpop.f32.mrb[6].mxu1 }
 0x426   : > { %1253 = vst [vmem:[%s2576_s22 + $0x8] sm:$0xff] %v1221_v62  ;;  %v1077_v25 = vadd.f32 %v1648_v44, %v2570_v54  ;;  %v1071_v17 = vpop.f32.mrb[7].mxu1 }
 0x427   : > { %1252 = vst [vmem:[%s2576_s22] sm:$0xff] %v1220_v57  ;;  %v1072_v45 = vadd.f32 %v2570_v54, %v1071_v17 }
 0x428   : > { %v1223_v32 = vmax.f32 %v1077_v25, 0.0 }
 0x429   : > { %v1222_v4 = vmax.f32 %v1072_v45, 0.0  ;;  %v1651_v27 = vpop.f32.mrb[8].mxu1 }
 0x42a   : > { %1255 = vst [vmem:[%s2576_s22 + $0x18] sm:$0xff] %v1223_v32  ;;  %v1087_v1 = vadd.f32 %v1651_v27, %v2570_v54  ;;  %v1081_v5 = vpop.f32.mrb[9].mxu1 }
 0x42b   : > { %1254 = vst [vmem:[%s2576_s22 + $0x10] sm:$0xff] %v1222_v4  ;;  %v1082_v6 = vadd.f32 %v2570_v54, %v1081_v5 }
 0x42c   : > { %v1225_v61 = vmax.f32 %v1087_v1, 0.0 }
 0x42d   : > { %v1224_v21 = vmax.f32 %v1082_v6, 0.0  ;;  %v1654_v24 = vpop.f32.mrb[10].mxu1 }
 0x42e   : > { %1257 = vst [vmem:[%s2576_s22 + $0x28] sm:$0xff] %v1225_v61  ;;  %v1097_v10 = vadd.f32 %v1654_v24, %v2570_v54  ;;  %v1091_v8 = vpop.f32.mrb[11].mxu1 }
 0x42f   : > { %1256 = vst [vmem:[%s2576_s22 + $0x20] sm:$0xff] %v1224_v21  ;;  %v1092_v11 = vadd.f32 %v2570_v54, %v1091_v8 }
 0x430   : > { %v1227_v12 = vmax.f32 %v1097_v10, 0.0 }
 0x431   : > { %v1226_v14 = vmax.f32 %v1092_v11, 0.0  ;;  %v1657_v18 = vpop.f32.mrb[12].mxu1 }
 0x432   : > { %1259 = vst [vmem:[%s2576_s22 + $0x38] sm:$0xff] %v1227_v12  ;;  %v1107_v19 = vadd.f32 %v1657_v18, %v2570_v54  ;;  %v1101_v20 = vpop.f32.mrb[13].mxu1 }
 0x433   : > { %1258 = vst [vmem:[%s2576_s22 + $0x30] sm:$0xff] %v1226_v14  ;;  %v1102_v23 = vadd.f32 %v2570_v54, %v1101_v20 }
 0x434   : > { %v1229_v26 = vmax.f32 %v1107_v19, 0.0 }
 0x435   : > { %v1228_v29 = vmax.f32 %v1102_v23, 0.0  ;;  %v1660_v30 = vpop.f32.mrb[14].mxu1 }
 0x436   : > { %1261 = vst [vmem:[%s2576_s22 + $0x48] sm:$0xff] %v1229_v26  ;;  %v1117_v33 = vadd.f32 %v1660_v30, %v2570_v54  ;;  %v1111_v36 = vpop.f32.mrb[15].mxu1 }
 0x437   : > { %1260 = vst [vmem:[%s2576_s22 + $0x40] sm:$0xff] %v1228_v29  ;;  %v1112_v39 = vadd.f32 %v2570_v54, %v1111_v36 }
 0x438   : > { %v1231_v40 = vmax.f32 %v1117_v33, 0.0 }
 0x439   : > { %v1230_v43 = vmax.f32 %v1112_v39, 0.0  ;;  %v1663_v46 = vpop.f32.mrb[16].mxu1 }
 0x43a   : > { %1263 = vst [vmem:[%s2576_s22 + $0x58] sm:$0xff] %v1231_v40  ;;  %v1127_v49 = vadd.f32 %v1663_v46, %v2570_v54  ;;  %v1121_v50 = vpop.f32.mrb[17].mxu1 }
 0x43b   : > { %1262 = vst [vmem:[%s2576_s22 + $0x50] sm:$0xff] %v1230_v43  ;;  %v1122_v53 = vadd.f32 %v2570_v54, %v1121_v50 }
 0x43c   : > { %v1233_v56 = vmax.f32 %v1127_v49, 0.0 }
 0x43d   : > { %v1232_v59 = vmax.f32 %v1122_v53, 0.0  ;;  %v1666_v60 = vpop.f32.mrb[18].mxu1 }
 0x43e   : > { %1265 = vst [vmem:[%s2576_s22 + $0x68] sm:$0xff] %v1233_v56  ;;  %v1137_v63 = vadd.f32 %v1666_v60, %v2570_v54  ;;  %v1131_v2 = vpop.f32.mrb[19].mxu1 }
 0x43f   : > { %1264 = vst [vmem:[%s2576_s22 + $0x60] sm:$0xff] %v1232_v59  ;;  %v1132_v7 = vadd.f32 %v2570_v54, %v1131_v2 }
 0x440   : > { %v1235_v9 = vmax.f32 %v1137_v63, 0.0 }
 0x441   : > { %v1234_v16 = vmax.f32 %v1132_v7, 0.0  ;;  %v1669_v22 = vpop.f32.mrb[20].mxu1 }
 0x442   : > { %1267 = vst [vmem:[%s2576_s22 + $0x78] sm:$0xff] %v1235_v9  ;;  %v1147_v28 = vadd.f32 %v1669_v22, %v2570_v54  ;;  %v1141_v34 = vpop.f32.mrb[21].mxu1 }
 0x443   : > { %1266 = vst [vmem:[%s2576_s22 + $0x70] sm:$0xff] %v1234_v16  ;;  %v1142_v38 = vadd.f32 %v2570_v54, %v1141_v34 }
 0x444   : > { %v1237_v51 = vmax.f32 %v1147_v28, 0.0 }
 0x445   : > { %v1236_v55 = vmax.f32 %v1142_v38, 0.0  ;;  %v1672_v3 = vpop.f32.mrb[22].mxu1 }
 0x446   : > { %1269 = vst [vmem:[%s2576_s22 + $0x88] sm:$0xff] %v1237_v51  ;;  %v1157_v15 = vadd.f32 %v1672_v3, %v2570_v54  ;;  %v1151_v35 = vpop.f32.mrb[23].mxu1 }
 0x447   : > { %1268 = vst [vmem:[%s2576_s22 + $0x80] sm:$0xff] %v1236_v55  ;;  %v1152_v42 = vadd.f32 %v2570_v54, %v1151_v35 }
 0x448   : > { %v1239_v13 = vmax.f32 %v1157_v15, 0.0 }
 0x449   : > { %v1238_v0 = vmax.f32 %v1152_v42, 0.0  ;;  %v1675_v58 = vpop.f32.mrb[24].mxu1 }
 0x44a   : > { %1271 = vst [vmem:[%s2576_s22 + $0x98] sm:$0xff] %v1239_v13  ;;  %v1167_v52 = vadd.f32 %v1675_v58, %v2570_v54  ;;  %v1161_v47 = vpop.f32.mrb[25].mxu1 }
 0x44b   : > { %1270 = vst [vmem:[%s2576_s22 + $0x90] sm:$0xff] %v1238_v0  ;;  %v1162_v41 = vadd.f32 %v2570_v54, %v1161_v47 }
 0x44c   : > { %v1241_v37 = vmax.f32 %v1167_v52, 0.0 }
 0x44d   : > { %v1240_v48 = vmax.f32 %v1162_v41, 0.0  ;;  %v1678_v31 = vpop.f32.mrb[26].mxu1 }
 0x44e   : > { %1273 = vst [vmem:[%s2576_s22 + $0xa8] sm:$0xff] %v1241_v37  ;;  %v1177_v62 = vadd.f32 %v1678_v31, %v2570_v54  ;;  %v1171_v57 = vpop.f32.mrb[27].mxu1 }
 0x44f   : > { %1272 = vst [vmem:[%s2576_s22 + $0xa0] sm:$0xff] %v1240_v48  ;;  %v1172_v44 = vadd.f32 %v2570_v54, %v1171_v57 }
 0x450   : > { %v1243_v25 = vmax.f32 %v1177_v62, 0.0 }
 0x451   : > { %v1242_v17 = vmax.f32 %v1172_v44, 0.0  ;;  %v1681_v45 = vpop.f32.mrb[28].mxu1 }
 0x452   : > { %1275 = vst [vmem:[%s2576_s22 + $0xb8] sm:$0xff] %v1243_v25  ;;  %v1187_v32 = vadd.f32 %v1681_v45, %v2570_v54  ;;  %v1181_v4 = vpop.f32.mrb[29].mxu1 }
 0x453   : > { %1274 = vst [vmem:[%s2576_s22 + $0xb0] sm:$0xff] %v1242_v17  ;;  %v1182_v27 = vadd.f32 %v2570_v54, %v1181_v4 }
 0x454   : > { %v1245_v1 = vmax.f32 %v1187_v32, 0.0 }
 0x455   : > { %v1244_v5 = vmax.f32 %v1182_v27, 0.0  ;;  %v1684_v6 = vpop.f32.mrb[30].mxu1 }
 0x456   : > { %1277 = vst [vmem:[%s2576_s22 + $0xc8] sm:$0xff] %v1245_v1  ;;  %v1197_v61 = vadd.f32 %v1684_v6, %v2570_v54  ;;  %v1191_v21 = vpop.f32.mrb[31].mxu1 }
 0x457   : > { %1276 = vst [vmem:[%s2576_s22 + $0xc0] sm:$0xff] %v1244_v5  ;;  %v1192_v24 = vadd.f32 %v2570_v54, %v1191_v21 }
 0x458   : > { %v1247_v10 = vmax.f32 %v1197_v61, 0.0 }
 0x459   : > { %v1246_v8 = vmax.f32 %v1192_v24, 0.0  ;;  %v1687_v11 = vpop.f32.mrb[32].mxu1 }
 0x45a   : > { %1279 = vst [vmem:[%s2576_s22 + $0xd8] sm:$0xff] %v1247_v10  ;;  %v1207_v12 = vadd.f32 %v1687_v11, %v2570_v54  ;;  %v1201_v14 = vpop.f32.mrb[33].mxu1 }
 0x45b   : > { %1278 = vst [vmem:[%s2576_s22 + $0xd0] sm:$0xff] %v1246_v8  ;;  %v1202_v18 = vadd.f32 %v2570_v54, %v1201_v14 }
 0x45c   : > { %v1249_v19 = vmax.f32 %v1207_v12, 0.0 }
 0x45d   : > { %v1248_v20 = vmax.f32 %v1202_v18, 0.0  ;;  %v1690_v23 = vpop.f32.mrb[34].mxu1 }
 0x45e   : > { %1281 = vst [vmem:[%s2576_s22 + $0xe8] sm:$0xff] %v1249_v19  ;;  %v1217_v26 = vadd.f32 %v1690_v23, %v2570_v54  ;;  %v1211_v29 = vpop.f32.mrb[35].mxu1 }
 0x45f   : > { %1280 = vst [vmem:[%s2576_s22 + $0xe0] sm:$0xff] %v1248_v20  ;;  %v1212_v30 = vadd.f32 %v2570_v54, %v1211_v29 }
 0x460   : > { %v1251_v33 = vmax.f32 %v1217_v26, 0.0 }
 0x461   : > { %v1250_v36 = vmax.f32 %v1212_v30, 0.0 }
 0x462   : > { %1283 = vst [vmem:[%s2576_s22 + $0xf8] sm:$0xff] %v1251_v33 }
 0x463   : > { %1282 = vst [vmem:[%s2576_s22 + $0xf0] sm:$0xff] %v1250_v36 }
 0x464   : > { %1851 = shalt.err (!%p1848_p2)
}
 0x465   : > { %s1852_s11 = scalar_lea.hbm %s2643_s21, 4096  ;;  %s1856_s22 = scalar_lea.hbm %s2698_s7, 8192 }
 0x466   : > { %p1853_p4 = scmp.ne.s32.totalorder %s2643_s21, %s1852_s11  ;;  %p1857_p9 = scmp.lt.u32.totalorder %s2643_s21, %s2698_s7 }
 0x467   : > { %p1858_p1 = scmp.lt.u32.totalorder %s1856_s22, %s1852_s11  ;;  %p1860_p6 = scmp.lt.u32.totalorder %s1852_s11, %s2643_s21 }
 0x468   : > { %p1854_p5 = pnand %p1853_p4, %p2735_p11 }
 0x469   : > { %p1859_p3 = por %p1858_p1, %p1857_p9 }
 0x46a   : > { %p1855_p7 = pneg %p1854_p5 }
 0x46b   : > { %p1861_p12 = por %p1860_p6, %p1859_p3 }
 0x46d   : > { %p1862_p13 = pnand %p1861_p12, %p1855_p7 }
 0x46f   : > { %1865 = shalt.err (!%p1862_p13)
}
 0x470   : > { %s1913_s19 = smov 128   ;;  %s1914_s15 = smov 8  }
 0x471   : > { %1753 = dma.vmem_to_hbm [thread:$0]  (%p2735_p11), %s2645_s23, 4096, %s2643_s21, %s1285_s28, %s1913_s19, %s1913_s19, %s1914_s15  }
 0x472 PF: > { %s1313_s9 = sand.u32 1, %s1892_s24   ;;  %p2736_p8 = scmp.ne.s32.totalorder %s2718_s14, 0 }
 0x473   : > { %p2737_p10 = scmp.ge.s32.totalorder %s1904_s27, 2  ;;  %s1314_s8 = scalar_lea.sflag [#allocation4], %s1313_s9 }
 0x475   : > { %p1760_p0 = pnand %p2737_p10, %p2736_p8 }
 0x477   : > { %1887 = dma.done.wait (!%p1760_p0), %s1314_s8, 4096  }
 0x478   : > { %1889 = vsyncadd (!%p1760_p0), %s1314_s8, 4294963200  ;;  %p20_p2 = scmp.ge.s32.totalorder %s1980_s30, 4   ;;  %s2738_s24 = smov %s1896_s25 }
 0x479   : > { %s2739_s25 = smov %s1900_s26  ;;  %s2740_s26 = smov %s1992_s10 }
 0x47a   : > { %s2741_s27 = smov %s1980_s30  ;;  %22 = sbr.rel (!%p20_p2) target bundleno = 5 (0x5), region = 93 }
 0x481   :  { %1319 = vsyncpa [#allocation3], 1 }
 0x482   :  { %1321 = vsyncpa [#allocation3 + $0x1], 1 }
 0x483   :  { %1322 = vsyncpa [#allocation4], 1 }
 0x484   :  { %1324 = vsyncpa [#allocation4 + $0x1], 1 }

</bundles_post_ra>
